<compile_context>
chip_gen: v5e
topology: v5e:2x2
jax: 0.10.0
libtpu: 0.0.40
codegen_flags: <defaults>
</compile_context>

<pallas_src>
import jax
import jax.numpy as jnp
from jax.experimental import pallas as pl
from jax.experimental.pallas import tpu as pltpu


def _round_up(x, m):
    return (x + m - 1) // m * m


# --------------------------------------------------------------------------
# Kernel
# --------------------------------------------------------------------------
def forward_decoder_kernel(z_ref, w1_ref, b1_ref, w2_ref, b2_ref, w3_ref, b3_ref, o_ref):
    """Fused 3-layer MLP on one batch tile: relu(z@W1+b1) -> relu(.@W2+b2) -> .@W3+b3.

    All matmuls run natively on the MXU as bf16 x bf16 -> f32; bias add and
    ReLU stay in f32.  Intermediates are re-cast to bf16 (needed for the next
    MXU pass and halves any VMEM spill traffic at large tiles).
    """
    z = z_ref[...]                                                     # bf16 (tm, d_in)
    h = jnp.dot(z, w1_ref[...], preferred_element_type=jnp.float32) + b1_ref[...]
    h = jnp.maximum(h, 0.0).astype(jnp.bfloat16)                       # relu
    # dropout1: identity (eval mode)
    h = jnp.dot(h, w2_ref[...], preferred_element_type=jnp.float32) + b2_ref[...]
    h = jnp.maximum(h, 0.0).astype(jnp.bfloat16)                       # relu
    # dropout2: identity (eval mode)
    o_ref[...] = jnp.dot(h, w3_ref[...], preferred_element_type=jnp.float32) + b3_ref[...]


# --------------------------------------------------------------------------
# Parameter construction / preparation
# --------------------------------------------------------------------------
def init_params(key, d_latent, hidden_units, n_channels, central_range):
    """Deterministic init matching normal_(0, 0.001) on all weights/biases.

    Weights kept as (in, out) so the kernel does x @ W (transpose of PyTorch
    layout).  Biases kept as (1, out).
    """
    h0, h1 = hidden_units
    out_dim = int(n_channels * central_range)
    ks = jax.random.split(key, 6)
    std = 0.001
    w1 = std * jax.random.normal(ks[0], (d_latent, h0), jnp.float32)
    b1 = std * jax.random.normal(ks[1], (1, h0), jnp.float32)
    w2 = std * jax.random.normal(ks[2], (h0, h1), jnp.float32)
    b2 = std * jax.random.normal(ks[3], (1, h1), jnp.float32)
    w3 = std * jax.random.normal(ks[4], (h1, out_dim), jnp.float32)
    b3 = std * jax.random.normal(ks[5], (1, out_dim), jnp.float32)
    return (w1, b1, w2, b2, w3, b3)


def prepare_params(params):
    """Zero-pad hidden dims to multiples of 128 and cast weights to bf16.

    Padding is exact: padded weight columns, padded bias entries AND the
    corresponding rows of the next layer's weight are all zero, so results
    are bit-equivalent through ReLU.  The final output dim is NOT padded (the
    kernel writes the true out_dim width directly).
    """
    w1, b1, w2, b2, w3, b3 = params
    d_latent, h0 = w1.shape
    h1 = w2.shape[1]
    out_dim = w3.shape[1]
    h0p = _round_up(h0, 128)
    h1p = _round_up(h1, 128)

    def pad2(a, rows, cols):
        return jnp.pad(a, ((0, rows - a.shape[0]), (0, cols - a.shape[1])))

    w1p = pad2(w1, d_latent, h0p).astype(jnp.bfloat16)
    b1p = pad2(b1, 1, h0p).astype(jnp.float32)
    w2p = pad2(w2, h0p, h1p).astype(jnp.bfloat16)
    b2p = pad2(b2, 1, h1p).astype(jnp.float32)
    w3p = pad2(w3, h1p, out_dim).astype(jnp.bfloat16)
    b3p = b3.astype(jnp.float32)
    return (w1p, b1p, w2p, b2p, w3p, b3p)


# --------------------------------------------------------------------------
# Wrapper
# --------------------------------------------------------------------------
def _mlp_bf16_xla(z_bf16, prepared_params):
    """Plain-XLA version of exactly the kernel math (used for the tiny-batch bypass)."""
    w1, b1, w2, b2, w3, b3 = prepared_params
    h = jnp.dot(z_bf16, w1, preferred_element_type=jnp.float32) + b1
    h = jnp.maximum(h, 0.0).astype(jnp.bfloat16)
    h = jnp.dot(h, w2, preferred_element_type=jnp.float32) + b2
    h = jnp.maximum(h, 0.0).astype(jnp.bfloat16)
    return jnp.dot(h, w3, preferred_element_type=jnp.float32) + b3


def forward_decoder(z, prepared_params, *, n_channels, central_range,
                    block_b=1024, small_batch_xla=False):
    """z: (B, d_latent) or (B, d_latent, ...) — flattened like z.view(B, -1)."""
    w1, b1, w2, b2, w3, b3 = prepared_params
    out_dim = int(n_channels * central_range)
    assert w3.shape[1] == out_dim

    B = z.shape[0]
    z2d = z.reshape(B, -1).astype(jnp.bfloat16)     # bf16 input: halves input HBM traffic
    d_in = z2d.shape[1]

    # Tiny-batch bypass: launch + DMA latency dominates, fused XLA wins.
    if small_batch_xla and B <= 64:
        out = _mlp_bf16_xla(z2d, prepared_params)
        return out.reshape(-1, 1, n_channels, central_range)

    # ---- batch tiling ----
    b_min = _round_up(B, 8)
    if b_min <= 256:
        # Single grid step: no pipelining machinery / double-buffer setup.
        tm = b_min
    else:
        tm = min(block_b, b_min)
        if tm >= b_min:
            # Tile would swallow the whole batch in one grid step; keep >= 2
            # steps so v7x's two TensorCores both get work (megacore split).
            tm = _round_up(pl.cdiv(b_min, 2), 8)
    b_pad = _round_up(B, tm)
    if b_pad != B:
        z2d = jnp.pad(z2d, ((0, b_pad - B), (0, 0)))
    grid = (b_pad // tm,)

    h0p, h1p = w1.shape[1], w2.shape[1]
    lane = lambda n: _round_up(n, 128)

    # Rough per-call VMEM estimate; only raise the scoped-VMEM limit if needed
    # (v5e default 16 MiB scoped; v7x has only 64 MiB physical).
    vmem_est = (
        2 * tm * lane(d_in) * 2             # z block, bf16, double-buffered
        + 2 * tm * lane(out_dim) * 4        # out block, f32, double-buffered
        + (lane(d_in) * h0p + h0p * h1p + h1p * lane(out_dim)) * 2   # bf16 weights
        + (h0p + h1p + lane(out_dim)) * 4                            # f32 biases
        + tm * (h0p + h1p) * 6              # f32 + bf16 copies of both intermediates
    )
    cp_kwargs = dict(dimension_semantics=("parallel",))
    if vmem_est > 12 * 2**20:
        cp_kwargs["vmem_limit_bytes"] = int(min(1.5 * vmem_est + (8 << 20), 56 << 20))

    flops = 2 * b_pad * (d_in * h0p + h0p * h1p + h1p * out_dim)
    bytes_accessed = int(
        b_pad * d_in * 2
        + (w1.size + w2.size + w3.size) * 2
        + (b1.size + b2.size + b3.size) * 4
        + b_pad * out_dim * 4
    )

    def resident(shape):
        # Weights/biases: constant block index -> fetched once, stay in VMEM.
        # Single-buffered: no useless second buffer / pipeline bookkeeping.
        return pl.BlockSpec(shape, lambda i: (0, 0), pipeline_mode=pl.Buffered(1))

    out = pl.pallas_call(
        forward_decoder_kernel,
        out_shape=jax.ShapeDtypeStruct((b_pad, out_dim), jnp.float32),
        grid=grid,
        in_specs=[
            pl.BlockSpec((tm, d_in), lambda i: (i, 0)),
            resident(w1.shape), resident(b1.shape),
            resident(w2.shape), resident(b2.shape),
            resident(w3.shape), resident(b3.shape),
        ],
        out_specs=pl.BlockSpec((tm, out_dim), lambda i: (i, 0)),
        compiler_params=pltpu.CompilerParams(**cp_kwargs),
        cost_estimate=pl.CostEstimate(flops=flops, transcendentals=0,
                                      bytes_accessed=bytes_accessed),
    )(z2d, w1, b1, w2, b2, w3, b3)

    if b_pad != B:
        out = out[:B]
    # matches X_reconstructed.reshape(-1, 1, n_channels, central_range)
    return out.reshape(-1, 1, n_channels, central_range)


# --------------------------------------------------------------------------
# References
# --------------------------------------------------------------------------
def reference_quantized(z, prepared_params, *, n_channels, central_range):
    """Pure-JAX reference using the same bf16 weights / bf16 activation casts as the kernel."""
    B = z.shape[0]
    z2d = z.reshape(B, -1).astype(jnp.bfloat16)
    x = _mlp_bf16_xla(z2d, prepared_params)
    return x.reshape(-1, 1, n_channels, central_range)


def reference_forward(z, params, *, n_channels, central_range):
    """Pure-JAX f32 reference mirroring the PyTorch forward (eval mode)."""
    w1, b1, w2, b2, w3, b3 = params
    B = z.shape[0]
    z2d = z.reshape(B, -1).astype(jnp.float32)
    h = jax.nn.relu(z2d @ w1 + b1)
    h = jax.nn.relu(h @ w2 + b2)
    x = h @ w3 + b3
    return x.reshape(-1, 1, n_channels, central_range)


# --------------------------------------------------------------------------
# Demo / self-test
# --------------------------------------------------------------------------
if __name__ == "__main__":
    # Shapes consistent with the module:
    #   d_latent=32, hidden_units=[100, 200], n_channels=4, central_range=16.
    d_latent = 32
    hidden_units = [100, 200]
    n_channels = 4
    central_range = 16
    out_dim = n_channels * central_range

    key = jax.random.PRNGKey(0)
    kz, kp, kz2 = jax.random.split(key, 3)
    params = init_params(kp, d_latent, hidden_units, n_channels, central_range)
    prepared = prepare_params(params)

    # --- small batch (B=2): single-grid-step Pallas path ---
    B = 2
    z = jax.random.normal(kz, (B, d_latent), jnp.float32)
    out = forward_decoder(z, prepared, n_channels=n_channels, central_range=central_range,
                          small_batch_xla=False)   # force the Pallas kernel
    out = jax.block_until_ready(out)
    assert out.shape == (B, 1, n_channels, central_range), out.shape

    ref_q = reference_quantized(z, prepared, n_channels=n_channels, central_range=central_range)
    assert jnp.allclose(out, ref_q, atol=1e-6, rtol=1e-3), "mismatch vs bf16-quantized reference"

    ref_f32 = reference_forward(z, params, n_channels=n_channels, central_range=central_range)
    assert jnp.allclose(out, ref_f32, atol=1e-5, rtol=1e-2), "mismatch vs f32 reference"

    # XLA tiny-batch bypass computes identical math.
    out_bypass = forward_decoder(z, prepared, n_channels=n_channels,
                                 central_range=central_range, small_batch_xla=True)
    assert jnp.allclose(out, out_bypass, atol=1e-6, rtol=1e-3), "bypass mismatch"

    # --- larger batch (B=300): multi-step grid, batch padding, v7x split ---
    B2 = 300
    z2 = jax.random.normal(kz2, (B2, d_latent), jnp.float32)
    out2 = jax.block_until_ready(
        forward_decoder(z2, prepared, n_channels=n_channels, central_range=central_range))
    assert out2.shape == (B2, 1, n_channels, central_range), out2.shape
    ref2 = reference_quantized(z2, prepared, n_channels=n_channels, central_range=central_range)
    assert jnp.allclose(out2, ref2, atol=1e-6, rtol=1e-3), "mismatch (large batch)"

    print("KERNEL_OK")
</pallas_src>

<mosaic_0001>
module attributes {stable_mosaic.version = 11 : i64} {
  func.func @forward_decoder_kernel(%arg0: i32, %arg1: memref<8x32xbf16, #tpu.memory_space<vmem>>, %arg2: memref<32x128xbf16, #tpu.memory_space<vmem>>, %arg3: memref<1x128xf32, #tpu.memory_space<vmem>>, %arg4: memref<128x256xbf16, #tpu.memory_space<vmem>>, %arg5: memref<1x256xf32, #tpu.memory_space<vmem>>, %arg6: memref<256x64xbf16, #tpu.memory_space<vmem>>, %arg7: memref<1x64xf32, #tpu.memory_space<vmem>>, %arg8: memref<8x64xf32, #tpu.memory_space<vmem>>) attributes {dimension_semantics = [#tpu.dimension_semantics<parallel>], iteration_bounds = array<i64: 1>, scalar_prefetch = 0 : i64, scratch_operands = 0 : i64, tpu.core_type = #tpu.core_type<tc>, window_params = [{transform_indices = @transform_0, window_bounds = array<i64: 8, 32>}, {pipeline_mode = #tpu.pipeline_mode<synchronous>, transform_indices = @transform_1, window_bounds = array<i64: 32, 128>}, {pipeline_mode = #tpu.pipeline_mode<synchronous>, transform_indices = @transform_2, window_bounds = array<i64: 1, 128>}, {pipeline_mode = #tpu.pipeline_mode<synchronous>, transform_indices = @transform_3, window_bounds = array<i64: 128, 256>}, {pipeline_mode = #tpu.pipeline_mode<synchronous>, transform_indices = @transform_4, window_bounds = array<i64: 1, 256>}, {pipeline_mode = #tpu.pipeline_mode<synchronous>, transform_indices = @transform_5, window_bounds = array<i64: 256, 64>}, {pipeline_mode = #tpu.pipeline_mode<synchronous>, transform_indices = @transform_6, window_bounds = array<i64: 1, 64>}, {transform_indices = @transform_7, window_bounds = array<i64: 8, 64>}]} {
    %c0 = arith.constant 0 : index
    %c0_0 = arith.constant 0 : index
    %0 = vector.load %arg1[%c0, %c0_0] : memref<8x32xbf16, #tpu.memory_space<vmem>>, vector<8x32xbf16>
    %c0_1 = arith.constant 0 : index
    %c0_2 = arith.constant 0 : index
    %1 = vector.load %arg2[%c0_1, %c0_2] : memref<32x128xbf16, #tpu.memory_space<vmem>>, vector<32x128xbf16>
    %cst = arith.constant dense<0.000000e+00> : vector<8x128xf32>
    %2 = tpu.matmul %0, %1, %cst {dimension_numbers = #tpu.dot_dimension_numbers<[1], [0], [0], [1], [0, 0, 1, 1], [], []>} : vector<8x32xbf16>, vector<32x128xbf16>, vector<8x128xf32> -> vector<8x128xf32>
    %c0_3 = arith.constant 0 : index
    %c0_4 = arith.constant 0 : index
    %3 = vector.load %arg3[%c0_3, %c0_4] : memref<1x128xf32, #tpu.memory_space<vmem>>, vector<1x128xf32>
    %4 = vector.broadcast %3 : vector<1x128xf32> to vector<8x128xf32>
    %5 = arith.addf %2, %4 : vector<8x128xf32>
    %cst_5 = arith.constant 0.000000e+00 : f32
    %6 = vector.broadcast %cst_5 : f32 to vector<8x128xf32>
    %7 = arith.maximumf %5, %6 : vector<8x128xf32>
    %8 = arith.truncf %7 : vector<8x128xf32> to vector<8x128xbf16>
    %c0_6 = arith.constant 0 : index
    %c0_7 = arith.constant 0 : index
    %9 = vector.load %arg4[%c0_6, %c0_7] : memref<128x256xbf16, #tpu.memory_space<vmem>>, vector<128x256xbf16>
    %cst_8 = arith.constant dense<0.000000e+00> : vector<8x256xf32>
    %10 = tpu.matmul %8, %9, %cst_8 {dimension_numbers = #tpu.dot_dimension_numbers<[1], [0], [0], [1], [0, 0, 1, 1], [], []>} : vector<8x128xbf16>, vector<128x256xbf16>, vector<8x256xf32> -> vector<8x256xf32>
    %c0_9 = arith.constant 0 : index
    %c0_10 = arith.constant 0 : index
    %11 = vector.load %arg5[%c0_9, %c0_10] : memref<1x256xf32, #tpu.memory_space<vmem>>, vector<1x256xf32>
    %12 = vector.broadcast %11 : vector<1x256xf32> to vector<8x256xf32>
    %13 = arith.addf %10, %12 : vector<8x256xf32>
    %cst_11 = arith.constant 0.000000e+00 : f32
    %14 = vector.broadcast %cst_11 : f32 to vector<8x256xf32>
    %15 = arith.maximumf %13, %14 : vector<8x256xf32>
    %16 = arith.truncf %15 : vector<8x256xf32> to vector<8x256xbf16>
    %c0_12 = arith.constant 0 : index
    %c0_13 = arith.constant 0 : index
    %17 = vector.load %arg6[%c0_12, %c0_13] : memref<256x64xbf16, #tpu.memory_space<vmem>>, vector<256x64xbf16>
    %cst_14 = arith.constant dense<0.000000e+00> : vector<8x64xf32>
    %18 = tpu.matmul %16, %17, %cst_14 {dimension_numbers = #tpu.dot_dimension_numbers<[1], [0], [0], [1], [0, 0, 1, 1], [], []>} : vector<8x256xbf16>, vector<256x64xbf16>, vector<8x64xf32> -> vector<8x64xf32>
    %c0_15 = arith.constant 0 : index
    %c0_16 = arith.constant 0 : index
    %19 = vector.load %arg7[%c0_15, %c0_16] : memref<1x64xf32, #tpu.memory_space<vmem>>, vector<1x64xf32>
    %20 = vector.broadcast %19 : vector<1x64xf32> to vector<8x64xf32>
    %21 = arith.addf %18, %20 : vector<8x64xf32>
    %c0_17 = arith.constant 0 : index
    %c0_18 = arith.constant 0 : index
    %22 = vector.load %arg8[%c0_17, %c0_18] : memref<8x64xf32, #tpu.memory_space<vmem>>, vector<8x64xf32>
    tpu.vector_store %arg8[%c0_17, %c0_18], %21 {strides = array<i32>} : memref<8x64xf32, #tpu.memory_space<vmem>>, vector<8x64xf32>,
    return
  }
  func.func @transform_0(%arg0: i32) -> (i32, i32) {
    %c0_i32 = arith.constant 0 : i32
    %c0_i32_0 = arith.constant 0 : i32
    return %arg0, %c0_i32 : i32, i32
  }
  func.func @transform_1(%arg0: i32) -> (i32, i32) {
    %c0_i32 = arith.constant 0 : i32
    %c0_i32_0 = arith.constant 0 : i32
    %c0_i32_1 = arith.constant 0 : i32
    return %c0_i32, %c0_i32_0 : i32, i32
  }
  func.func @transform_2(%arg0: i32) -> (i32, i32) {
    %c0_i32 = arith.constant 0 : i32
    %c0_i32_0 = arith.constant 0 : i32
    %c0_i32_1 = arith.constant 0 : i32
    return %c0_i32, %c0_i32_0 : i32, i32
  }
  func.func @transform_3(%arg0: i32) -> (i32, i32) {
    %c0_i32 = arith.constant 0 : i32
    %c0_i32_0 = arith.constant 0 : i32
    %c0_i32_1 = arith.constant 0 : i32
    return %c0_i32, %c0_i32_0 : i32, i32
  }
  func.func @transform_4(%arg0: i32) -> (i32, i32) {
    %c0_i32 = arith.constant 0 : i32
    %c0_i32_0 = arith.constant 0 : i32
    %c0_i32_1 = arith.constant 0 : i32
    return %c0_i32, %c0_i32_0 : i32, i32
  }
  func.func @transform_5(%arg0: i32) -> (i32, i32) {
    %c0_i32 = arith.constant 0 : i32
    %c0_i32_0 = arith.constant 0 : i32
    %c0_i32_1 = arith.constant 0 : i32
    return %c0_i32, %c0_i32_0 : i32, i32
  }
  func.func @transform_6(%arg0: i32) -> (i32, i32) {
    %c0_i32 = arith.constant 0 : i32
    %c0_i32_0 = arith.constant 0 : i32
    %c0_i32_1 = arith.constant 0 : i32
    return %c0_i32, %c0_i32_0 : i32, i32
  }
  func.func @transform_7(%arg0: i32) -> (i32, i32) {
    %c0_i32 = arith.constant 0 : i32
    %c0_i32_0 = arith.constant 0 : i32
    return %arg0, %c0_i32 : i32, i32
  }
}

</mosaic_0001>

<bundles_post_ra>
// kernel: tpu_custom_call.1
= control target key start
LH: loop header
LB: loop body
LE: loop exit
PB: predicated region body
PF: predicated region fallthrough
CT: control target
= control target key end

     0   :  { %vm49_vm0 = vcmask 261120   ;;  %s782_s0 = inlined_call_operand.vmem [shape: bf16[8,32], index: 0, kind: input, shape index: {}]   ;;  %s783_s1 = inlined_call_operand.vmem [shape: bf16[32,128], index: 1, kind: input, shape index: {}]   ;;  %s784_s2 = inlined_call_operand.vmem [shape: f32[1,128], index: 2, kind: input, shape index: {}]   ;;  %s785_s3 = inlined_call_operand.vmem [shape: bf16[128,256], index: 3, kind: input, shape index: {}]   ;;  %s786_s4 = inlined_call_operand.vmem [shape: f32[1,256], index: 4, kind: input, shape index: {}]   ;;  %s787_s5 = inlined_call_operand.vmem [shape: bf16[256,64], index: 5, kind: input, shape index: {}]   ;;  %s788_s6 = inlined_call_operand.vmem [shape: f32[1,64], index: 6, kind: input, shape index: {}]   ;;  %s789_s7 = inlined_call_operand.hbm [shape: f32[8,64], index: 7, kind: output, shape index: {}]  }
   0x1   :  { %v514_v0 = vld [vmem:[%s783_s1 + $0x8] sm:$0xff]  ;;  %v513_v1 = vld [vmem:[%s783_s1] sm:$0xff]  ;;  %v443_v2 = vld [vmem:[%s785_s3 + $0x70] sm:$0xf] }
   0x2   :  { %v530_v3 = vld [vmem:[%s785_s3 + $0x74] sm:$0xf0]  ;;  %v529_v4 = vld [vmem:[%s785_s3 + $0x74] sm:$0xf]  ;;  %59 = vmatpush.bf16.msra.mxu0 %v514_v0  ;;  %v445_v6 = vld [vmem:[%s785_s3 + $0x78] sm:$0xf0] }
   0x3   :  { %v444_v5 = vor.u32 %v530_v3, %v443_v2  ;;  %v435_v7 = vld [vmem:[%s785_s3 + $0x60] sm:$0xf]  ;;  %v528_v8 = vld [vmem:[%s785_s3 + $0x64] sm:$0xf0]  ;;  %v448_v9 = vor.u32 %v529_v4, %v445_v6  ;;  %v527_v10 = vld [vmem:[%s785_s3 + $0x64] sm:$0xf] }
   0x4   :  { %v437_v11 = vld [vmem:[%s785_s3 + $0x68] sm:$0xf0]  ;;  %v436_v12 = vor.u32 %v528_v8, %v435_v7  ;;  %v28_v13 = vld [vmem:[%s782_s0] sm:$0xf]  ;;  %v427_v15 = vld [vmem:[%s785_s3 + $0x50] sm:$0xf] }
   0x5   :  { %170 = vmatpush.bf16.msra.mxu1 %v444_v5  ;;  %183 = vmatpush.bf16.msra.mxu2 %v448_v9  ;;  %v440_v14 = vor.u32 %v527_v10, %v437_v11  ;;  %v526_v16 = vld [vmem:[%s785_s3 + $0x54] sm:$0xf0]  ;;  %v525_v17 = vld [vmem:[%s785_s3 + $0x54] sm:$0xf]  ;;  %v429_v18 = vld [vmem:[%s785_s3 + $0x58] sm:$0xf0] }
   0x6   :  { %60 = vmatpush.bf16.msra.mxu0 %v513_v1  ;;  %v428_v19 = vor.u32 %v526_v16, %v427_v15  ;;  %v419_v20 = vld [vmem:[%s785_s3 + $0x40] sm:$0xf]  ;;  %v432_v21 = vor.u32 %v525_v17, %v429_v18  ;;  %v524_v22 = vld [vmem:[%s785_s3 + $0x44] sm:$0xf0]  ;;  %v523_v23 = vld [vmem:[%s785_s3 + $0x44] sm:$0xf] }
   0x7   :  { %v421_v24 = vld [vmem:[%s785_s3 + $0x48] sm:$0xf0] }
   0x9   :  { %171 = vmatpush.bf16.msra.mxu1 %v436_v12  ;;  %384 = vmatmul.msk.bf16.vlgmr.msra.gmra.mxu0 %vm49_vm0, %v28_v13 }
   0xa   :  { %184 = vmatpush.bf16.msra.mxu2 %v440_v14 }
   0xb   :  { %12 = vsyncpa [#allocation3], 0  ;;  %v420_v25 = vor.u32 %v524_v22, %v419_v20  ;;  %v424_v26 = vor.u32 %v523_v23, %v421_v24  ;;  %v411_v27 = vld [vmem:[%s785_s3 + $0x30] sm:$0xf]  ;;  %v522_v28 = vld [vmem:[%s785_s3 + $0x34] sm:$0xf0] }
   0xc   :  { %v521_v29 = vld [vmem:[%s785_s3 + $0x34] sm:$0xf]  ;;  %v413_v30 = vld [vmem:[%s785_s3 + $0x38] sm:$0xf0]  ;;  %v412_v31 = vor.u32 %v522_v28, %v411_v27  ;;  %v403_v33 = vld [vmem:[%s785_s3 + $0x20] sm:$0xf] }
   0xd   :  { %172 = vmatpush.bf16.msra.mxu1 %v428_v19  ;;  %v416_v32 = vor.u32 %v521_v29, %v413_v30  ;;  %v520_v34 = vld [vmem:[%s785_s3 + $0x24] sm:$0xf0]  ;;  %v519_v35 = vld [vmem:[%s785_s3 + $0x24] sm:$0xf]  ;;  %v405_v36 = vld [vmem:[%s785_s3 + $0x28] sm:$0xf0] }
   0xe   :  { %185 = vmatpush.bf16.msra.mxu2 %v432_v21  ;;  %v404_v37 = vor.u32 %v520_v34, %v403_v33  ;;  %v408_v38 = vor.u32 %v519_v35, %v405_v36  ;;  %v395_v39 = vld [vmem:[%s785_s3 + $0x10] sm:$0xf]  ;;  %v518_v40 = vld [vmem:[%s785_s3 + $0x14] sm:$0xf0]  ;;  %v517_v41 = vld [vmem:[%s785_s3 + $0x14] sm:$0xf] }
   0xf   :  { %v396_v42 = vor.u32 %v518_v40, %v395_v39  ;;  %v397_v43 = vld [vmem:[%s785_s3 + $0x18] sm:$0xf0]  ;;  %v387_v45 = vld [vmem:[%s785_s3] sm:$0xf]  ;;  %v516_v46 = vld [vmem:[%s785_s3 + $0x4] sm:$0xf0] }
  0x10   :  { %v400_v44 = vor.u32 %v517_v41, %v397_v43  ;;  %v515_v47 = vld [vmem:[%s785_s3 + $0x4] sm:$0xf]  ;;  %v388_v48 = vor.u32 %v516_v46, %v387_v45  ;;  %v389_v49 = vld [vmem:[%s785_s3 + $0x8] sm:$0xf0]  ;;  %v538_v51 = vld [vmem:[%s787_s5 + $0x38] sm:$0xff]  ;;  %s367_s8 = sshll.u32 %s789_s7, 4  ;;  %s368_s8 = int_to_ptr.hbm [resolvable:$true] %s367_s8 }
  0x11   :  { %173 = vmatpush.bf16.msra.mxu1 %v420_v25  ;;  %v392_v50 = vor.u32 %v515_v47, %v389_v49  ;;  %v546_v52 = vld [vmem:[%s787_s5 + $0x78] sm:$0xff]  ;;  %332 = vmatpush.bf16.msra.mxu3 %v538_v51  ;;  %v537_v53 = vld [vmem:[%s787_s5 + $0x30] sm:$0xff]  ;;  %v536_v55 = vld [vmem:[%s787_s5 + $0x28] sm:$0xff]  ;;  %vm358_vm1 = vcmask 523264  }
  0x12   :  { %186 = vmatpush.bf16.msra.mxu2 %v424_v26  ;;  %345 = vmatpush.bf16.msrb.mxu0 %v546_v52  ;;  %v545_v54 = vld [vmem:[%s787_s5 + $0x70] sm:$0xff]  ;;  %v544_v56 = vld [vmem:[%s787_s5 + $0x68] sm:$0xff]  ;;  %v535_v57 = vld [vmem:[%s787_s5 + $0x20] sm:$0xff] }
  0x13   :  { %v543_v58 = vld [vmem:[%s787_s5 + $0x60] sm:$0xff]  ;;  %v534_v59 = vld [vmem:[%s787_s5 + $0x18] sm:$0xff]  ;;  %v533_v61 = vld [vmem:[%s787_s5 + $0x10] sm:$0xff] }
  0x14   :  { %v542_v60 = vld [vmem:[%s787_s5 + $0x58] sm:$0xff]  ;;  %v548_v62 = vld [vmem:[%s784_s2] ss:$0 sm:$0xff]  ;;  %v532_v4 = vld [vmem:[%s787_s5 + $0x8] sm:$0xff] }
  0x15   :  { %174 = vmatpush.bf16.msra.mxu1 %v412_v31  ;;  %333 = vmatpush.bf16.msra.mxu3 %v537_v53  ;;  %v541_v5 = vld [vmem:[%s787_s5 + $0x50] sm:$0xff]  ;;  %v531_v6 = vld [vmem:[%s787_s5] sm:$0xff]  ;;  %v540_v7 = vld [vmem:[%s787_s5 + $0x48] sm:$0xff] }
  0x16   :  { %187 = vmatpush.bf16.msra.mxu2 %v416_v32  ;;  %346 = vmatpush.bf16.msrb.mxu0 %v545_v54  ;;  %v539_v8 = vld [vmem:[%s787_s5 + $0x40] sm:$0xff] }
  0x17   :  { %v84_v9 = vld [vmem:[%s786_s4] sm:$0x3]  ;;  %s576_s4 = smov [#allocation2]  }
  0x18   :  { %v86_v10 = vperm.slane %v84_v9, 0  ;;  %v87_v14 = vperm.slane %v84_v9, 1  ;;  %v549_v22 = vld [vmem:[%s788_s6] ss:$0 sm:$0xff]  ;;  %s365_s29 = sshll.u32 %s576_s4, 4  ;;  %s366_s29 = int_to_ptr.vmem [resolvable:$true] %s365_s29 }
  0x19   :  { %175 = vmatpush.bf16.msra.mxu1 %v404_v37  ;;  %334 = vmatpush.bf16.msra.mxu3 %v536_v55 }
  0x1a   :  { %188 = vmatpush.bf16.msra.mxu2 %v408_v38  ;;  %347 = vmatpush.bf16.msrb.mxu0 %v544_v56 }
  0x1d   :  { %176 = vmatpush.bf16.msra.mxu1 %v396_v42  ;;  %335 = vmatpush.bf16.msra.mxu3 %v535_v57 }
  0x1e   :  { %189 = vmatpush.bf16.msra.mxu2 %v400_v44  ;;  %348 = vmatpush.bf16.msrb.mxu0 %v543_v58 }
  0x21   :  { %177 = vmatpush.bf16.msra.mxu1 %v388_v48  ;;  %336 = vmatpush.bf16.msra.mxu3 %v534_v59 }
  0x22   :  { %190 = vmatpush.bf16.msra.mxu2 %v392_v50  ;;  %349 = vmatpush.bf16.msrb.mxu0 %v542_v60 }
  0x25   :  { %337 = vmatpush.bf16.msra.mxu3 %v533_v61 }
  0x26   :  { %350 = vmatpush.bf16.msrb.mxu0 %v541_v5 }
  0x29   :  { %338 = vmatpush.bf16.msra.mxu3 %v532_v4 }
  0x2a   :  { %351 = vmatpush.bf16.msrb.mxu0 %v540_v7 }
  0x2d   :  { %339 = vmatpush.bf16.msra.mxu3 %v531_v6 }
  0x2e   :  { %352 = vmatpush.bf16.msrb.mxu0 %v539_v8 }
  0x86   :  { %v62_v63 = vpop.f32.mrf.mxu0 }
  0x87   :  { %v63_v0 = vadd.f32 %v548_v62, %v62_v63 }
  0x89   :  { %v66_v1 = vmax.f32 %v63_v0, 0.0 }
  0x8b   :  { %v67_v2 = vpack.c.bf16 %v66_v1, %v66_v1 }
  0x8d   :  { %178 = vmatmul.bf16.vlgmr.msra.gmra.mxu1 %v67_v2  ;;  %191 = vmatmul.bf16.vlgmr.msra.gmra.mxu2 %v67_v2 }
  0x8e   :  { %v64_v3 = vpop.f32.mrf.mxu0 }
 0x10a   :  { %v179_v11 = vpop.f32.mrf.mxu1 }
 0x10b   :  { %v180_v12 = vadd.f32 %v179_v11, %v86_v10 }
 0x10d   :  { %v196_v13 = vmax.f32 %v180_v12, 0.0 }
 0x10f   :  { %v198_v15 = vpack.c.bf16 %v196_v13, %v196_v13 }
 0x110   :  { %v192_v16 = vpop.f32.mrf.mxu2 }
 0x111   :  { %v193_v17 = vadd.f32 %v192_v16, %v87_v14  ;;  %340 = vmatmul.bf16.vlgmr.msra.gmra.mxu3 %v198_v15 }
 0x112   :  { %v181_v18 = vpop.f32.mrf.mxu1 }
 0x113   :  { %v197_v19 = vmax.f32 %v193_v17, 0.0 }
 0x115   :  { %v199_v20 = vpack.c.bf16 %v197_v19, %v197_v19 }
 0x117   :  { %353 = vmatmul.bf16.vlgmr.msrb.gmra.mxu0 %v199_v20 }
 0x118   :  { %v194_v21 = vpop.f32.mrf.mxu2 }
 0x194   :  { %v341_v23 = vpop.f32.mrf.mxu3  ;;  %v354_v24 = vpop.f32.mrf.mxu0 }
 0x195   :  { %v342_v25 = vadd.f32 %v549_v22, %v341_v23 }
 0x197   :  { %v355_v26 = vadd.f32 %v354_v24, %v342_v25 }
 0x199   :  { %359 = vst.msk [vmem:[#allocation2] sm:$0xff] %vm358_vm1, %v355_v26 }
 0x19a   :  { %370 = dma.vmem_to_hbm [thread:$0]  %s366_s29, 128, %s368_s8, [#allocation3]  }
 0x19c   :  { %v343_v27 = vpop.f32.mrf.mxu3  ;;  %v356_v28 = vpop.f32.mrf.mxu0 }
 0x19d   :  { %574 = dma.done.wait [#allocation3], 128  }
 0x19e   :  { %575 = vsyncadd [#allocation3], 4294967168 }
 0x19f   :  { %375 = vsyncpa [#allocation3], 1 }

</bundles_post_ra>
